<compile_context>
chip_gen: v7x
topology: tpu7x:2x2x1
jax: 0.10.0
libtpu: 0.0.40
codegen_flags: <defaults>
</compile_context>

<pallas_src>
import jax
import jax.numpy as jnp
from jax.experimental import pallas as pl
from jax.experimental.pallas import tpu as pltpu


def _round_up(x, m):
    return ((x + m - 1) // m) * m


def _network_kernel(x_ref, w1_ref, b1_ref, w2_ref, b2_ref, wh_ref, bh_ref, out_ref):
    x = x_ref[...]                                                   # (tb, S)

    # layer1 + relu
    h1 = jnp.dot(x, w1_ref[...], preferred_element_type=jnp.float32) + b1_ref[...]
    h1 = jnp.maximum(h1, 0.0)                                        # (tb, 128)

    # layer2 + relu
    h2 = jnp.dot(h1, w2_ref[...], preferred_element_type=jnp.float32) + b2_ref[...]
    h2 = jnp.maximum(h2, 0.0)                                        # (tb, 64)

    # Fused dueling head, transposed (batch on the lane axis), "NT" matmul:
    #   rows [0, A): adv + val ; row A: per-example sum_a adv ; rows > A: padding.
    head_t = jax.lax.dot_general(
        wh_ref[...], h2, (((1,), (1,)), ((), ())),
        preferred_element_type=jnp.float32) + bh_ref[...]            # (A_pad, tb)

    out_ref[...] = head_t


def network_forward(state, params, *, tile_b=1024):
    (w1, b1, w2, b2, wa, ba, wv, bv) = params
    batch, state_size = state.shape
    hidden2, n_actions = wa.shape
    a_pad = _round_up(n_actions + 1, 8)   # action rows + adv-sum row, sublane-padded

    # Fused, transposed dueling-head weight/bias (tiny, built once per call).
    wh = jnp.zeros((a_pad, hidden2), jnp.float32)
    wh = wh.at[:n_actions, :].set((wa + wv).T)            # adv + val combined
    wh = wh.at[n_actions, :].set(jnp.sum(wa, axis=1))     # per-example sum_a adv
    bh = jnp.zeros((a_pad, 1), jnp.float32)
    bh = bh.at[:n_actions, 0].set((ba + bv).reshape(n_actions))
    bh = bh.at[n_actions, 0].set(jnp.sum(ba))

    # Batch tiling: tile rows are a multiple of 128 (batch sits on the lane axis
    # of the transposed output); pad batch to a whole number of tiles.
    tb = min(tile_b, _round_up(batch, 128))
    tb = _round_up(tb, 128)
    b_pad = _round_up(batch, tb)
    x = state if b_pad == batch else jnp.pad(state, ((0, b_pad - batch), (0, 0)))

    resident = lambda i: (0, 0)  # weights/biases stay put across batch tiles

    out_t = pl.pallas_call(
        _network_kernel,
        out_shape=jax.ShapeDtypeStruct((a_pad, b_pad), jnp.float32),
        grid_spec=pltpu.PrefetchScalarGridSpec(
            num_scalar_prefetch=0,
            grid=(b_pad // tb,),
            in_specs=[
                pl.BlockSpec((tb, state_size), lambda i: (i, 0)),  # x: batch-tiled
                pl.BlockSpec(w1.shape, resident),
                pl.BlockSpec(b1.shape, resident),
                pl.BlockSpec(w2.shape, resident),
                pl.BlockSpec(b2.shape, resident),
                pl.BlockSpec(wh.shape, resident),
                pl.BlockSpec(bh.shape, resident),
            ],
            out_specs=pl.BlockSpec((a_pad, tb), lambda i: (0, i)),  # per-tile output
        ),
        compiler_params=pltpu.CompilerParams(
            dimension_semantics=("parallel",)),
    )(x, w1, b1, w2, b2, wh, bh)

    # Global dueling-mean subtraction on the tiny head slab, in the wrapper.
    # Row `n_actions` holds sum_a adv per example; padded batch columns are sliced off.
    adv_sum = jnp.sum(out_t[n_actions, :batch])
    mean = adv_sum * (1.0 / float(batch * n_actions))
    return out_t[:n_actions, :batch].T - mean


def xavier_uniform(key, fan_in, fan_out):
    # matches nn.init.xavier_uniform_ bound; returned already transposed (in, out)
    limit = jnp.sqrt(6.0 / (fan_in + fan_out))
    return jax.random.uniform(key, (fan_in, fan_out), jnp.float32, -limit, limit)


def init_params(key, state_size, action_size, hidden_units=(128, 64)):
    k1, k2, k3, k4 = jax.random.split(key, 4)
    h1, h2 = hidden_units
    w1 = xavier_uniform(k1, state_size, h1)
    b1 = jnp.zeros((1, h1), jnp.float32)
    w2 = xavier_uniform(k2, h1, h2)
    b2 = jnp.zeros((1, h2), jnp.float32)
    wa = xavier_uniform(k3, h2, action_size)
    ba = jnp.zeros((1, action_size), jnp.float32)
    wv = xavier_uniform(k4, h2, 1)
    bv = jnp.zeros((1, 1), jnp.float32)
    return (w1, b1, w2, b2, wa, ba, wv, bv)


def reference_forward(state, params):
    (w1, b1, w2, b2, wa, ba, wv, bv) = params
    h1 = jnp.maximum(state @ w1 + b1, 0.0)
    h2 = jnp.maximum(h1 @ w2 + b2, 0.0)
    adv = h2 @ wa + ba
    val = h2 @ wv + bv
    return adv + val - jnp.mean(adv)


if __name__ == "__main__":
    key = jax.random.PRNGKey(0)
    k_param, k_state1, k_state2 = jax.random.split(key, 3)

    state_size = 16
    action_size = 4

    params = init_params(k_param, state_size, action_size)

    # Small test: single tile, batch smaller than one tile (padding path).
    state = jax.random.normal(k_state1, (8, state_size), jnp.float32)
    out = jax.block_until_ready(network_forward(state, params))
    ref = reference_forward(state, params)
    assert out.shape == (8, action_size)
    assert jnp.allclose(out, ref, atol=1e-4, rtol=1e-4)

    # Multi-tile test: ragged batch across several 128-row tiles (parallel grid,
    # wrapper-side global mean over only the valid rows).
    state2 = jax.random.normal(k_state2, (300, state_size), jnp.float32)
    out2 = jax.block_until_ready(network_forward(state2, params, tile_b=128))
    ref2 = reference_forward(state2, params)
    assert out2.shape == (300, action_size)
    assert jnp.allclose(out2, ref2, atol=1e-4, rtol=1e-4)

    print("KERNEL_OK")
</pallas_src>

<mosaic_0001>
module attributes {stable_mosaic.version = 11 : i64} {
  func.func @_network_kernel(%arg0: i32, %arg1: memref<128x16xf32, #tpu.memory_space<vmem>>, %arg2: memref<16x128xf32, #tpu.memory_space<vmem>>, %arg3: memref<1x128xf32, #tpu.memory_space<vmem>>, %arg4: memref<128x64xf32, #tpu.memory_space<vmem>>, %arg5: memref<1x64xf32, #tpu.memory_space<vmem>>, %arg6: memref<8x64xf32, #tpu.memory_space<vmem>>, %arg7: memref<8x1xf32, #tpu.memory_space<vmem>>, %arg8: memref<8x128xf32, #tpu.memory_space<vmem>>) attributes {dimension_semantics = [#tpu.dimension_semantics<parallel>], iteration_bounds = array<i64: 1>, scalar_prefetch = 0 : i64, scratch_operands = 0 : i64, tpu.core_type = #tpu.core_type<tc>, window_params = [{transform_indices = @transform_0, window_bounds = array<i64: 128, 16>}, {pipeline_mode = #tpu.pipeline_mode<synchronous>, transform_indices = @transform_1, window_bounds = array<i64: 16, 128>}, {pipeline_mode = #tpu.pipeline_mode<synchronous>, transform_indices = @transform_2, window_bounds = array<i64: 1, 128>}, {pipeline_mode = #tpu.pipeline_mode<synchronous>, transform_indices = @transform_3, window_bounds = array<i64: 128, 64>}, {pipeline_mode = #tpu.pipeline_mode<synchronous>, transform_indices = @transform_4, window_bounds = array<i64: 1, 64>}, {pipeline_mode = #tpu.pipeline_mode<synchronous>, transform_indices = @transform_5, window_bounds = array<i64: 8, 64>}, {pipeline_mode = #tpu.pipeline_mode<synchronous>, transform_indices = @transform_6, window_bounds = array<i64: 8, 1>}, {transform_indices = @transform_7, window_bounds = array<i64: 8, 128>}]} {
    %c0 = arith.constant 0 : index
    %c0_0 = arith.constant 0 : index
    %0 = vector.load %arg1[%c0, %c0_0] : memref<128x16xf32, #tpu.memory_space<vmem>>, vector<128x16xf32>
    %c0_1 = arith.constant 0 : index
    %c0_2 = arith.constant 0 : index
    %1 = vector.load %arg2[%c0_1, %c0_2] : memref<16x128xf32, #tpu.memory_space<vmem>>, vector<16x128xf32>
    %cst = arith.constant dense<0.000000e+00> : vector<128x128xf32>
    %2 = tpu.matmul %0, %1, %cst {dimension_numbers = #tpu.dot_dimension_numbers<[1], [0], [0], [1], [0, 0, 1, 1], [], []>} : vector<128x16xf32>, vector<16x128xf32>, vector<128x128xf32> -> vector<128x128xf32>
    %c0_3 = arith.constant 0 : index
    %c0_4 = arith.constant 0 : index
    %3 = vector.load %arg3[%c0_3, %c0_4] : memref<1x128xf32, #tpu.memory_space<vmem>>, vector<1x128xf32>
    %4 = vector.broadcast %3 : vector<1x128xf32> to vector<128x128xf32>
    %5 = arith.addf %2, %4 : vector<128x128xf32>
    %cst_5 = arith.constant 0.000000e+00 : f32
    %6 = vector.broadcast %cst_5 : f32 to vector<128x128xf32>
    %7 = arith.maximumf %5, %6 : vector<128x128xf32>
    %c0_6 = arith.constant 0 : index
    %c0_7 = arith.constant 0 : index
    %8 = vector.load %arg4[%c0_6, %c0_7] : memref<128x64xf32, #tpu.memory_space<vmem>>, vector<128x64xf32>
    %cst_8 = arith.constant dense<0.000000e+00> : vector<128x64xf32>
    %9 = tpu.matmul %7, %8, %cst_8 {dimension_numbers = #tpu.dot_dimension_numbers<[1], [0], [0], [1], [0, 0, 1, 1], [], []>} : vector<128x128xf32>, vector<128x64xf32>, vector<128x64xf32> -> vector<128x64xf32>
    %c0_9 = arith.constant 0 : index
    %c0_10 = arith.constant 0 : index
    %10 = vector.load %arg5[%c0_9, %c0_10] : memref<1x64xf32, #tpu.memory_space<vmem>>, vector<1x64xf32>
    %11 = vector.broadcast %10 : vector<1x64xf32> to vector<128x64xf32>
    %12 = arith.addf %9, %11 : vector<128x64xf32>
    %cst_11 = arith.constant 0.000000e+00 : f32
    %13 = vector.broadcast %cst_11 : f32 to vector<128x64xf32>
    %14 = arith.maximumf %12, %13 : vector<128x64xf32>
    %c0_12 = arith.constant 0 : index
    %c0_13 = arith.constant 0 : index
    %15 = vector.load %arg6[%c0_12, %c0_13] : memref<8x64xf32, #tpu.memory_space<vmem>>, vector<8x64xf32>
    %cst_14 = arith.constant dense<0.000000e+00> : vector<8x128xf32>
    %16 = tpu.matmul %15, %14, %cst_14 {dimension_numbers = #tpu.dot_dimension_numbers<[1], [1], [0], [0], [0, 0, 1, 0], [], []>} : vector<8x64xf32>, vector<128x64xf32>, vector<8x128xf32> -> vector<8x128xf32>
    %c0_15 = arith.constant 0 : index
    %c0_16 = arith.constant 0 : index
    %17 = vector.load %arg7[%c0_15, %c0_16] : memref<8x1xf32, #tpu.memory_space<vmem>>, vector<8x1xf32>
    %18 = vector.broadcast %17 : vector<8x1xf32> to vector<8x128xf32>
    %19 = arith.addf %16, %18 : vector<8x128xf32>
    %c0_17 = arith.constant 0 : index
    %c0_18 = arith.constant 0 : index
    %20 = vector.load %arg8[%c0_17, %c0_18] : memref<8x128xf32, #tpu.memory_space<vmem>>, vector<8x128xf32>
    tpu.vector_store %arg8[%c0_17, %c0_18], %19 {strides = array<i32>} : memref<8x128xf32, #tpu.memory_space<vmem>>, vector<8x128xf32>,
    return
  }
  func.func @transform_0(%arg0: i32) -> (i32, i32) {
    %c0_i32 = arith.constant 0 : i32
    %c0_i32_0 = arith.constant 0 : i32
    return %arg0, %c0_i32 : i32, i32
  }
  func.func @transform_1(%arg0: i32) -> (i32, i32) {
    %c0_i32 = arith.constant 0 : i32
    %c0_i32_0 = arith.constant 0 : i32
    %c0_i32_1 = arith.constant 0 : i32
    return %c0_i32, %c0_i32_0 : i32, i32
  }
  func.func @transform_2(%arg0: i32) -> (i32, i32) {
    %c0_i32 = arith.constant 0 : i32
    %c0_i32_0 = arith.constant 0 : i32
    %c0_i32_1 = arith.constant 0 : i32
    return %c0_i32, %c0_i32_0 : i32, i32
  }
  func.func @transform_3(%arg0: i32) -> (i32, i32) {
    %c0_i32 = arith.constant 0 : i32
    %c0_i32_0 = arith.constant 0 : i32
    %c0_i32_1 = arith.constant 0 : i32
    return %c0_i32, %c0_i32_0 : i32, i32
  }
  func.func @transform_4(%arg0: i32) -> (i32, i32) {
    %c0_i32 = arith.constant 0 : i32
    %c0_i32_0 = arith.constant 0 : i32
    %c0_i32_1 = arith.constant 0 : i32
    return %c0_i32, %c0_i32_0 : i32, i32
  }
  func.func @transform_5(%arg0: i32) -> (i32, i32) {
    %c0_i32 = arith.constant 0 : i32
    %c0_i32_0 = arith.constant 0 : i32
    %c0_i32_1 = arith.constant 0 : i32
    return %c0_i32, %c0_i32_0 : i32, i32
  }
  func.func @transform_6(%arg0: i32) -> (i32, i32) {
    %c0_i32 = arith.constant 0 : i32
    %c0_i32_0 = arith.constant 0 : i32
    %c0_i32_1 = arith.constant 0 : i32
    return %c0_i32, %c0_i32_0 : i32, i32
  }
  func.func @transform_7(%arg0: i32) -> (i32, i32) {
    %c0_i32 = arith.constant 0 : i32
    %c0_i32_0 = arith.constant 0 : i32
    return %c0_i32, %arg0 : i32, i32
  }
}

</mosaic_0001>

<bundles_post_ra>
// kernel: tpu_custom_call.1
= control target key start
LH: loop header
LB: loop body
LE: loop exit
PB: predicated region body
PF: predicated region fallthrough
CT: control target
= control target key end

     0   :  { %vm52_vm0 = vcmask 130048   ;;  %s1127_s0 = inlined_call_operand.vmem [shape: f32[128,16], index: 0, kind: input, shape index: {}]   ;;  %s1128_s1 = inlined_call_operand.vmem [shape: f32[16,128], index: 1, kind: input, shape index: {}]   ;;  %s1129_s2 = inlined_call_operand.vmem [shape: f32[1,128], index: 2, kind: input, shape index: {}]   ;;  %s1130_s3 = inlined_call_operand.vmem [shape: f32[128,64], index: 3, kind: input, shape index: {}]   ;;  %s1131_s4 = inlined_call_operand.vmem [shape: f32[1,64], index: 4, kind: input, shape index: {}]   ;;  %s1132_s5 = inlined_call_operand.vmem [shape: f32[8,64], index: 5, kind: input, shape index: {}]   ;;  %s1133_s6 = inlined_call_operand.vmem [shape: f32[8,1], index: 6, kind: input, shape index: {}]   ;;  %s1134_s7 = inlined_call_operand.hbm [shape: f32[8,128], index: 7, kind: output, shape index: {}]  }
   0x1   :  { %v43_v0 = vld [vmem:[%s1128_s1] sm:$0xff]  ;;  %v44_v1 = vld [vmem:[%s1128_s1 + $0x8] sm:$0xff]  ;;  %v29_v5 = vld [vmem:[%s1127_s0 + $0x10] sm:$0xff] }
   0x2   :  { %v27_v2 = vld [vmem:[%s1127_s0] sm:$0xff]  ;;  %v811_v3 = vpack.c.bf16 %v44_v1, %v43_v0  ;;  %v28_v4 = vld [vmem:[%s1127_s0 + $0x8] sm:$0xff]  ;;  %v264_v8 = vld [vmem:[%s1130_s3 + $0x10] sm:$0xff] }
   0x3   :  { %696 = vmatprep.mubr.msk.f32.mxu1 %vm52_vm0, %v27_v2  ;;  %v262_v6 = vld [vmem:[%s1130_s3] sm:$0xff]  ;;  %v263_v7 = vld [vmem:[%s1130_s3 + $0x8] sm:$0xff]  ;;  %v265_v10 = vld [vmem:[%s1130_s3 + $0x18] sm:$0xff] }
   0x4   :  { %812 = vmatprep.subr.bf16.mxu1 %v811_v3  ;;  %v815_v9 = vpack.c.bf16 %v263_v7, %v262_v6  ;;  %v30_v11 = vld [vmem:[%s1127_s0 + $0x18] sm:$0xff]  ;;  %v819_v12 = vpack.c.bf16 %v265_v10, %v264_v8  ;;  %v266_v13 = vld [vmem:[%s1130_s3 + $0x20] sm:$0xff]  ;;  %v267_v14 = vld [vmem:[%s1130_s3 + $0x28] sm:$0xff] }
   0x5   :  { %814 = vmatpush3.bf16.msra.mxu1 %v811_v3  ;;  %v31_v15 = vld [vmem:[%s1127_s0 + $0x20] sm:$0xff] }
   0x6   :  { %816 = vmatprep.subr.bf16.mxu1 %v815_v9 }
   0x8   :  { %697 = vmatmul.mubr.msk.f32.vlgmr.msra.gmra.mrb[0].mxu1 %vm52_vm0, %v28_v4 }
   0x9   :  { %699 = vmatprep.mubr.msk.f32.mxu1 %vm52_vm0, %v29_v5  ;;  %818 = vmatpush3.bf16.msra.mxu1 %v815_v9 }
   0xa   :  { %12 = vsyncpa [#allocation3], 0  ;;  %820 = vmatprep.subr.bf16.mxu1 %v819_v12  ;;  %v823_v16 = vpack.c.bf16 %v267_v14, %v266_v13  ;;  %v32_v17 = vld [vmem:[%s1127_s0 + $0x28] sm:$0xff]  ;;  %v268_v18 = vld [vmem:[%s1130_s3 + $0x30] sm:$0xff]  ;;  %vm910_vm1 = vmmov 0   ;;  %vm453_vm2 = vcmask 523264  }
   0xb   :  { %v269_v19 = vld [vmem:[%s1130_s3 + $0x38] sm:$0xff]  ;;  %v33_v20 = vld [vmem:[%s1127_s0 + $0x30] sm:$0xff]  ;;  %v270_v23 = vld [vmem:[%s1130_s3 + $0x40] sm:$0xff]  ;;  %s913_s23 = smov [#allocation2]  }
   0xc   :  { %700 = vmatmul.mubr.msk.f32.gmra.mrb[2].mxu1 %vm52_vm0, %v30_v11  ;;  %v827_v21 = vpack.c.bf16 %v269_v19, %v268_v18  ;;  %v34_v22 = vld [vmem:[%s1127_s0 + $0x38] sm:$0xff]  ;;  %v271_v24 = vld [vmem:[%s1130_s3 + $0x48] sm:$0xff]  ;;  %v35_v25 = vld [vmem:[%s1127_s0 + $0x40] sm:$0xff]  ;;  %s582_s24 = sshll.u32 %s913_s23, 4  ;;  %s583_s24 = int_to_ptr.vmem [resolvable:$true] %s582_s24 }
   0xd   :  { %702 = vmatprep.mubr.msk.f32.mxu1 %vm52_vm0, %v31_v15  ;;  %822 = vmatpush3.bf16.msra.mxu1 %v819_v12  ;;  %v831_v26 = vpack.c.bf16 %v271_v24, %v270_v23  ;;  %v36_v27 = vld [vmem:[%s1127_s0 + $0x48] sm:$0xff]  ;;  %v272_v28 = vld [vmem:[%s1130_s3 + $0x50] sm:$0xff]  ;;  %v273_v29 = vld [vmem:[%s1130_s3 + $0x58] sm:$0xff]  ;;  %s885_s25 = scalar_lea.vmem %s583_s24, 128  ;;  %p890_p1 = scmp.lt.s32.totalorder %s583_s24, %s583_s24 }
   0xe   :  { %824 = vmatprep.subr.bf16.mxu1 %v823_v16  ;;  %v37_v30 = vld [vmem:[%s1127_s0 + $0x50] sm:$0xff]  ;;  %v835_v31 = vpack.c.bf16 %v273_v29, %v272_v28  ;;  %v38_v32 = vld [vmem:[%s1127_s0 + $0x58] sm:$0xff]  ;;  %v274_v33 = vld [vmem:[%s1130_s3 + $0x60] sm:$0xff]  ;;  %v909_v28 = vmov 0.0|0.0   ;;  %v911_v29 = vmov 0.0   ;;  %p886_p0 = scmp.ne.s32.totalorder %s583_s24, %s885_s25  ;;  %p891_p2 = scmp.lt.s32.totalorder %s885_s25, %s885_s25 }
   0xf   :  { %v275_v34 = vld [vmem:[%s1130_s3 + $0x68] sm:$0xff]  ;;  %v39_v35 = vld [vmem:[%s1127_s0 + $0x60] sm:$0xff]  ;;  %v41_v38 = vld [vmem:[%s1127_s0 + $0x70] sm:$0xff]  ;;  %847 = vmatprep.subr.bf16.mxu0 %v909_v28  ;;  %808 = vmatprep.mubr.msk.f32.mxu0 %vm910_vm1, %v911_v29 }
  0x10   :  { %703 = vmatmul.mubr.msk.f32.gmra.mrb[4].mxu1 %vm52_vm0, %v32_v17  ;;  %v839_v36 = vpack.c.bf16 %v275_v34, %v274_v33  ;;  %v40_v37 = vld [vmem:[%s1127_s0 + $0x68] sm:$0xff]  ;;  %v42_v39 = vld [vmem:[%s1127_s0 + $0x78] sm:$0xff]  ;;  %v276_v40 = vld [vmem:[%s1130_s3 + $0x70] sm:$0xff]  ;;  %p892_p3 = por %p891_p2, %p890_p1 }
  0x11   :  { %705 = vmatprep.mubr.msk.f32.mxu1 %vm52_vm0, %v33_v20  ;;  %826 = vmatpush3.bf16.msra.mxu1 %v823_v16  ;;  %v277_v41 = vld [vmem:[%s1130_s3 + $0x78] sm:$0xff]  ;;  %v590_v43 = vld [vmem:[%s1129_s2] ss:$0 sm:$0xff]  ;;  %vm1084_vm3 = vmpackc.low %vm453_vm2, %vm453_vm2 }
  0x12   :  { %828 = vmatprep.subr.bf16.mxu1 %v827_v21  ;;  %v843_v42 = vpack.c.bf16 %v277_v41, %v276_v40  ;;  %p893_p4 = pnand %p892_p3, %p886_p0 }
  0x14   :  { %706 = vmatmul.mubr.msk.f32.gmra.mrb[6].mxu1 %vm52_vm0, %v34_v22 }
  0x15   :  { %708 = vmatprep.mubr.msk.f32.mxu1 %vm52_vm0, %v35_v25  ;;  %830 = vmatpush3.bf16.msra.mxu1 %v827_v21 }
  0x16   :  { %832 = vmatprep.subr.bf16.mxu1 %v831_v26 }
  0x18   :  { %709 = vmatmul.mubr.msk.f32.gmra.mrb[8].mxu1 %vm52_vm0, %v36_v27 }
  0x19   :  { %711 = vmatprep.mubr.msk.f32.mxu1 %vm52_vm0, %v37_v30  ;;  %834 = vmatpush3.bf16.msra.mxu1 %v831_v26  ;;  %v447_v30 = vld [vmem:[%s1133_s6] sm:$0xff] }
  0x1a   :  { %836 = vmatprep.subr.bf16.mxu1 %v835_v31 }
  0x1c   :  { %712 = vmatmul.mubr.msk.f32.gmra.mrb[10].mxu1 %vm52_vm0, %v38_v32  ;;  %v607_v32 = vld [vmem:[%s1131_s4] ss:$0 sm:$0xff] }
  0x1d   :  { %714 = vmatprep.mubr.msk.f32.mxu1 %vm52_vm0, %v39_v35  ;;  %838 = vmatpush3.bf16.msra.mxu1 %v835_v31  ;;  %v912_v31 = vmov 0  }
  0x1e   :  { %840 = vmatprep.subr.bf16.mxu1 %v839_v36  ;;  %884 = vset.pattern.permute.xlu0 %v912_v31 }
  0x1f   :  { %450 = vperm.xlu0 %884, %v447_v30  }
  0x20   :  { %715 = vmatmul.mubr.msk.f32.gmra.mrb[12].mxu1 %vm52_vm0, %v40_v37 }
  0x21   :  { %717 = vmatprep.mubr.msk.f32.mxu1 %vm52_vm0, %v41_v38  ;;  %842 = vmatpush3.bf16.msra.mxu1 %v839_v36 }
  0x22   :  { %844 = vmatprep.subr.bf16.mxu1 %v843_v42 }
  0x24   :  { %718 = vmatmul.mubr.msk.f32.gmra.mrb[14].mxu1 %vm52_vm0, %v42_v39 }
  0x25   :  { %846 = vmatpush3.bf16.msra.mxu1 %v843_v42 }
  0xdb   :  { %v698_v44 = vpop.f32.mrb[0].mxu1 }
  0xdc   :  { %v173_v45 = vadd.f32 %v698_v44, %v590_v43  ;;  %v167_v46 = vpop.f32.mrb[1].mxu1 }
  0xdd   :  { %v168_v47 = vadd.f32 %v590_v43, %v167_v46 }
  0xde   :  { %v247_v50 = vmax.f32 %v173_v45, 0.0 }
  0xdf   :  { %v246_v48 = vmax.f32 %v168_v47, 0.0  ;;  %v701_v49 = vpop.f32.mrb[2].mxu1 }
  0xe0   :  { %v183_v51 = vadd.f32 %v701_v49, %v590_v43  ;;  %v177_v52 = vpop.f32.mrb[3].mxu1 }
  0xe1   :  { %v178_v53 = vadd.f32 %v590_v43, %v177_v52  ;;  %752 = vmatprep.mubr.f32.mxu1 %v246_v48 }
  0xe2   :  { %v249_v54 = vmax.f32 %v183_v51, 0.0  ;;  %753 = vmatmul.mubr.f32.vlgmr.msra.gmra.mrb[16].mxu1 %v247_v50 }
  0xe3   :  { %v248_v55 = vmax.f32 %v178_v53, 0.0  ;;  %v704_v56 = vpop.f32.mrb[4].mxu1 }
  0xe4   :  { %v193_v57 = vadd.f32 %v704_v56, %v590_v43  ;;  %v187_v58 = vpop.f32.mrb[5].mxu1 }
  0xe5   :  { %755 = vmatprep.mubr.f32.mxu1 %v248_v55  ;;  %v188_v59 = vadd.f32 %v590_v43, %v187_v58 }
  0xe6   :  { %756 = vmatmul.mubr.f32.gmra.mrb[18].mxu1 %v249_v54  ;;  %v251_v60 = vmax.f32 %v193_v57, 0.0 }
  0xe7   :  { %v250_v61 = vmax.f32 %v188_v59, 0.0  ;;  %v707_v62 = vpop.f32.mrb[6].mxu1 }
  0xe8   :  { %v203_v63 = vadd.f32 %v707_v62, %v590_v43  ;;  %v197_v0 = vpop.f32.mrb[7].mxu1 }
  0xe9   :  { %758 = vmatprep.mubr.f32.mxu1 %v250_v61  ;;  %v198_v1 = vadd.f32 %v590_v43, %v197_v0 }
  0xea   :  { %759 = vmatmul.mubr.f32.gmra.mrb[20].mxu1 %v251_v60  ;;  %v253_v2 = vmax.f32 %v203_v63, 0.0 }
  0xeb   :  { %v252_v3 = vmax.f32 %v198_v1, 0.0  ;;  %v710_v4 = vpop.f32.mrb[8].mxu1 }
  0xec   :  { %v213_v5 = vadd.f32 %v710_v4, %v590_v43  ;;  %v207_v6 = vpop.f32.mrb[9].mxu1 }
  0xed   :  { %761 = vmatprep.mubr.f32.mxu1 %v252_v3  ;;  %v208_v7 = vadd.f32 %v590_v43, %v207_v6 }
  0xee   :  { %762 = vmatmul.mubr.f32.gmra.mrb[22].mxu1 %v253_v2  ;;  %v255_v8 = vmax.f32 %v213_v5, 0.0 }
  0xef   :  { %v254_v9 = vmax.f32 %v208_v7, 0.0  ;;  %v713_v10 = vpop.f32.mrb[10].mxu1 }
  0xf0   :  { %v223_v11 = vadd.f32 %v713_v10, %v590_v43  ;;  %v217_v12 = vpop.f32.mrb[11].mxu1 }
  0xf1   :  { %764 = vmatprep.mubr.f32.mxu1 %v254_v9  ;;  %v218_v13 = vadd.f32 %v590_v43, %v217_v12 }
  0xf2   :  { %765 = vmatmul.mubr.f32.gmra.mrb[24].mxu1 %v255_v8  ;;  %v257_v14 = vmax.f32 %v223_v11, 0.0 }
  0xf3   :  { %v256_v15 = vmax.f32 %v218_v13, 0.0  ;;  %v716_v16 = vpop.f32.mrb[12].mxu1 }
  0xf4   :  { %v233_v17 = vadd.f32 %v716_v16, %v590_v43  ;;  %v227_v18 = vpop.f32.mrb[13].mxu1 }
  0xf5   :  { %767 = vmatprep.mubr.f32.mxu1 %v256_v15  ;;  %v228_v19 = vadd.f32 %v590_v43, %v227_v18 }
  0xf6   :  { %768 = vmatmul.mubr.f32.gmra.mrb[26].mxu1 %v257_v14  ;;  %v259_v20 = vmax.f32 %v233_v17, 0.0 }
  0xf7   :  { %v258_v21 = vmax.f32 %v228_v19, 0.0  ;;  %v719_v22 = vpop.f32.mrb[14].mxu1 }
  0xf8   :  { %v243_v23 = vadd.f32 %v719_v22, %v590_v43  ;;  %v237_v24 = vpop.f32.mrb[15].mxu1 }
  0xf9   :  { %770 = vmatprep.mubr.f32.mxu1 %v258_v21  ;;  %v238_v25 = vadd.f32 %v590_v43, %v237_v24 }
  0xfa   :  { %771 = vmatmul.mubr.f32.gmra.mrb[28].mxu1 %v259_v20  ;;  %v261_v26 = vmax.f32 %v243_v23, 0.0 }
  0xfb   :  { %v260_v27 = vmax.f32 %v238_v25, 0.0 }
  0xfd   :  { %773 = vmatprep.mubr.f32.mxu1 %v260_v27  ;;  %v451_v27 = vpop.permute.xlu0 %450 }
  0xfe   :  { %774 = vmatmul.mubr.f32.gmra.mrb[30].mxu1 %v261_v26  ;;  %v446_v26 = vld [vmem:[%s1132_s5] sm:$0xff] }
 0x1b5   :  { %v754_v33 = vpop.f32.mrb[16].mxu1 }
 0x1b6   :  { %v357_v34 = vadd.f32 %v754_v33, %v607_v32  ;;  %v351_v35 = vpop.f32.mrb[17].mxu1 }
 0x1b7   :  { %v352_v36 = vadd.f32 %v607_v32, %v351_v35 }
 0x1b8   :  { %v431_v37 = vmax.f32 %v357_v34, 0.0 }
 0x1b9   :  { %v430_v38 = vmax.f32 %v352_v36, 0.0  ;;  %v757_v39 = vpop.f32.mrb[18].mxu1 }
 0x1ba   :  { %v367_v40 = vadd.f32 %v757_v39, %v607_v32  ;;  %v361_v41 = vpop.f32.mrb[19].mxu1 }
 0x1bb   :  { %v848_v43 = vpack.c.bf16 %v431_v37, %v430_v38  ;;  %v362_v44 = vadd.f32 %v607_v32, %v361_v41 }
 0x1bc   :  { %v433_v45 = vmax.f32 %v367_v40, 0.0 }
 0x1bd   :  { %v432_v46 = vmax.f32 %v362_v44, 0.0  ;;  %850 = vmatpush3.bf16.xpose.msk.msra.mxu0 %vm1084_vm3, %v848_v43  ;;  %v760_v47 = vpop.f32.mrb[20].mxu1 }
 0x1be   :  { %v377_v48 = vadd.f32 %v760_v47, %v607_v32  ;;  %v371_v49 = vpop.f32.mrb[21].mxu1  ;;  %851 = vmatprep.subr.bf16.mxu0 %v909_v28 }
 0x1bf   :  { %v852_v50 = vpack.c.bf16 %v433_v45, %v432_v46  ;;  %v372_v51 = vadd.f32 %v607_v32, %v371_v49 }
 0x1c0   :  { %v435_v52 = vmax.f32 %v377_v48, 0.0 }
 0x1c1   :  { %v434_v53 = vmax.f32 %v372_v51, 0.0  ;;  %v763_v54 = vpop.f32.mrb[22].mxu1 }
 0x1c2   :  { %v387_v55 = vadd.f32 %v763_v54, %v607_v32  ;;  %v381_v56 = vpop.f32.mrb[23].mxu1 }
 0x1c3   :  { %v856_v57 = vpack.c.bf16 %v435_v52, %v434_v53  ;;  %v382_v58 = vadd.f32 %v607_v32, %v381_v56 }
 0x1c4   :  { %v437_v59 = vmax.f32 %v387_v55, 0.0 }
 0x1c5   :  { %854 = vmatpush3.bf16.xpose.msk.msra.mxu0 %vm1084_vm3, %v852_v50  ;;  %v436_v60 = vmax.f32 %v382_v58, 0.0  ;;  %v766_v61 = vpop.f32.mrb[24].mxu1 }
 0x1c6   :  { %855 = vmatprep.subr.bf16.mxu0 %v909_v28  ;;  %v397_v62 = vadd.f32 %v766_v61, %v607_v32  ;;  %v391_v63 = vpop.f32.mrb[25].mxu1 }
 0x1c7   :  { %v860_v0 = vpack.c.bf16 %v437_v59, %v436_v60  ;;  %v392_v1 = vadd.f32 %v607_v32, %v391_v63 }
 0x1c8   :  { %v439_v2 = vmax.f32 %v397_v62, 0.0 }
 0x1c9   :  { %v438_v3 = vmax.f32 %v392_v1, 0.0  ;;  %v769_v4 = vpop.f32.mrb[26].mxu1 }
 0x1ca   :  { %v407_v5 = vadd.f32 %v769_v4, %v607_v32  ;;  %v401_v6 = vpop.f32.mrb[27].mxu1 }
 0x1cb   :  { %v864_v7 = vpack.c.bf16 %v439_v2, %v438_v3  ;;  %v402_v8 = vadd.f32 %v607_v32, %v401_v6 }
 0x1cc   :  { %v441_v9 = vmax.f32 %v407_v5, 0.0 }
 0x1cd   :  { %858 = vmatpush3.bf16.xpose.msk.msra.mxu0 %vm1084_vm3, %v856_v57  ;;  %v440_v10 = vmax.f32 %v402_v8, 0.0  ;;  %v772_v11 = vpop.f32.mrb[28].mxu1 }
 0x1ce   :  { %859 = vmatprep.subr.bf16.mxu0 %v909_v28  ;;  %v417_v12 = vadd.f32 %v772_v11, %v607_v32  ;;  %v411_v13 = vpop.f32.mrb[29].mxu1 }
 0x1cf   :  { %v868_v14 = vpack.c.bf16 %v441_v9, %v440_v10  ;;  %v412_v15 = vadd.f32 %v607_v32, %v411_v13 }
 0x1d0   :  { %v443_v16 = vmax.f32 %v417_v12, 0.0 }
 0x1d1   :  { %v442_v17 = vmax.f32 %v412_v15, 0.0  ;;  %v775_v18 = vpop.f32.mrb[30].mxu1 }
 0x1d2   :  { %v427_v19 = vadd.f32 %v775_v18, %v607_v32  ;;  %v421_v20 = vpop.f32.mrb[31].mxu1 }
 0x1d3   :  { %v872_v21 = vpack.c.bf16 %v443_v16, %v442_v17  ;;  %v422_v22 = vadd.f32 %v607_v32, %v421_v20 }
 0x1d4   :  { %v445_v23 = vmax.f32 %v427_v19, 0.0 }
 0x1d5   :  { %862 = vmatpush3.bf16.xpose.msk.msra.mxu0 %vm1084_vm3, %v860_v0  ;;  %v444_v24 = vmax.f32 %v422_v22, 0.0 }
 0x1d6   :  { %863 = vmatprep.subr.bf16.mxu0 %v909_v28 }
 0x1d7   :  { %v876_v25 = vpack.c.bf16 %v445_v23, %v444_v24 }
 0x1dd   :  { %866 = vmatpush3.bf16.xpose.msk.msra.mxu0 %vm1084_vm3, %v864_v7 }
 0x1de   :  { %867 = vmatprep.subr.bf16.mxu0 %v909_v28 }
 0x1e5   :  { %870 = vmatpush3.bf16.xpose.msk.msra.mxu0 %vm1084_vm3, %v868_v14 }
 0x1e6   :  { %871 = vmatprep.subr.bf16.mxu0 %v909_v28 }
 0x1ed   :  { %874 = vmatpush3.bf16.xpose.msk.msra.mxu0 %vm1084_vm3, %v872_v21 }
 0x1ee   :  { %875 = vmatprep.subr.bf16.mxu0 %v909_v28 }
 0x1f5   :  { %878 = vmatpush3.bf16.xpose.msk.msra.mxu0 %vm1084_vm3, %v876_v25 }
 0x1fc   :  { %809 = vmatmul.mubr.msk.f32.vlgmr.msra.gmra.mrb[0].mxu0 %vm453_vm2, %v446_v26 }
 0x2cf   :  { %v571_v29 = vpop.f32.mrb[0].mxu0 }
 0x2d0   :  { %v572_v30 = vadd.f32 %v571_v29, %v451_v27  ;;  %v810_v31 = vpop.f32.mrb[1].mxu0 }
 0x2d2   :  { %575 = vst [vmem:[#allocation2] sm:$0xff] %v572_v30 }
 0x2d3   :  { %896 = shalt.err (!%p893_p4)
}
 0x2d4   :  { %s897_s5 = scalar_lea.hbm %s1134_s7, 128 }
 0x2d5   :  { %p898_p5 = scmp.ne.s32.totalorder %s1134_s7, %s897_s5  ;;  %p901_p6 = scmp.lt.u32.totalorder %s897_s5, %s1134_s7 }
 0x2d7   :  { %p903_p7 = pnand %p901_p6, %p898_p5 }
 0x2d9   :  { %906 = shalt.err (!%p903_p7)
}
 0x2da   :  { %585 = dma.vmem_to_hbm [thread:$0]  %s583_s24, 128, %s1134_s7, [#allocation3]  }
 0x2db   :  { %907 = dma.done.wait [#allocation3], 128  }
 0x2dc   :  { %908 = vsyncadd [#allocation3], 4294967168 }
 0x2dd   :  { %589 = vsyncpa [#allocation3], 1 }

</bundles_post_ra>
